<compile_context>
chip_gen: v5e
topology: v5e:2x2
jax: 0.10.0
libtpu: 0.0.40
codegen_flags: <defaults>
</compile_context>

<pallas_src>
import jax
import jax.numpy as jnp
from jax.experimental import pallas as pl
from jax.experimental.pallas import tpu as pltpu


def _round_up(x, m):
    return ((x + m - 1) // m) * m


def _cdiv(a, b):
    return -(-a // b)


def _tpu_defaults():
    """Returns (vmem_limit_bytes, target spatial tile width) per TPU generation."""
    try:
        kind = jax.devices()[0].device_kind.lower()
    except Exception:
        kind = ""
    if ("v5" in kind) or ("v6" in kind):
        # 128 MiB physical VMEM parts: big tiles amortize per-grid-step overhead.
        return 100 * 1024 * 1024, 2048
    # v7x (64 MiB / TensorCore) or unknown: leave 10+ MiB of headroom.
    return 48 * 1024 * 1024, 1024


def _upconv_kernel(x_ref, w_ref, b_ref, o_ref):
    # x_ref: (Cin, TM)   w_ref: (Kflat, Cin)   b_ref: (Kflat, 1)   o_ref: (Kflat, TM)
    acc = jnp.dot(w_ref[...], x_ref[...], preferred_element_type=jnp.float32)
    acc = acc + b_ref[...]                      # bias broadcast over lanes
    o_ref[...] = jnp.maximum(acc, 0.0).astype(o_ref.dtype)


@jax.jit
def upconv_forward(x, weight, bias):
    """ConvTranspose3d(kernel=2, stride=2) + ReLU.

    x:      (N, Cin, D, H, W)    float32, NCDHW (PyTorch convention)
    weight: (Cin, Cout, 2, 2, 2) float32 (PyTorch ConvTranspose3d weight layout)
    bias:   (Cout,)              float32
    returns (N, Cout, 2D, 2H, 2W) float32
    """
    N, Cin, D, H, W = x.shape
    Cout = weight.shape[1]
    Kflat = Cout * 8
    DHW = D * H * W

    vmem_limit, tm_target = _tpu_defaults()

    # ---- tile sizing --------------------------------------------------------
    Cin_p = _round_up(Cin, 8)                       # sublane-align contraction dim
    per_col = 2 * 4 * (Cin_p + Kflat)               # double-buffered in + out, f32
    fixed = 2 * 4 * (Kflat * Cin_p + Kflat) + (2 << 20)
    tm = max(128, _round_up(tm_target, 128))
    while tm > 128 and fixed + per_col * tm > int(0.8 * vmem_limit):
        tm -= 128

    # Ragged-friendly spatial padding: pad DHW only to a multiple of 128 and
    # split into near-equal 128-aligned tiles.
    dhw128 = _round_up(DHW, 128)
    num_m = max(1, _cdiv(dhw128, tm))
    tm_eff = _round_up(_cdiv(dhw128, num_m), 128)
    DHWp = num_m * tm_eff

    # ---- operand prep (all on the 1x-sized input / tiny weights) ------------
    x3 = x.reshape(N, Cin, DHW)
    pad_c, pad_m = Cin_p - Cin, DHWp - DHW
    if pad_c or pad_m:
        x3 = jnp.pad(x3, ((0, 0), (0, pad_c), (0, pad_m)))

    # (Cin, Cout, 2, 2, 2) -> (Kflat, Cin_p), transposed so the kernel emits
    # lane-dense (Kflat, TM) tiles; rows ordered (co, kd, kh, kw).
    w2 = weight.reshape(Cin, Kflat).T
    if pad_c:
        w2 = jnp.pad(w2, ((0, 0), (0, pad_c)))      # zero rows: no contribution
    b2 = jnp.repeat(bias, 8).reshape(Kflat, 1)

    grid = (N, num_m)
    cost = pl.CostEstimate(
        flops=2 * N * Kflat * Cin * DHW,
        transcendentals=0,
        bytes_accessed=4 * (N * Cin * DHW + Kflat * Cin + Kflat + N * Kflat * DHW),
    )

    y = pl.pallas_call(
        _upconv_kernel,
        out_shape=jax.ShapeDtypeStruct((N, Kflat, DHWp), jnp.float32),
        grid=grid,
        in_specs=[
            # (Cin, TM) input block: Cin on sublanes, spatial on lanes,
            # contiguous rows of the original NCDHW buffer.
            pl.BlockSpec((None, Cin_p, tm_eff), lambda n, m: (n, 0, m)),
            # Grid-invariant weight / bias blocks (fetched once, kept resident).
            pl.BlockSpec((Kflat, Cin_p), lambda n, m: (0, 0)),
            pl.BlockSpec((Kflat, 1), lambda n, m: (0, 0)),
        ],
        out_specs=pl.BlockSpec((None, Kflat, tm_eff), lambda n, m: (n, 0, m)),
        compiler_params=pltpu.CompilerParams(
            dimension_semantics=("parallel", "parallel"),
            vmem_limit_bytes=vmem_limit,
        ),
        cost_estimate=cost,
    )(x3, w2, b2)

    # (N, Kflat, DHWp) -> drop pad -> (N, Cout, kd, kh, kw, D, H, W)
    y = y[:, :, :DHW].reshape(N, Cout, 2, 2, 2, D, H, W)
    # Interleave: -> (N, Cout, D, kd, H, kh, W, kw) -> (N, Cout, 2D, 2H, 2W)
    y = jnp.transpose(y, (0, 1, 5, 2, 6, 3, 7, 4))
    return y.reshape(N, Cout, 2 * D, 2 * H, 2 * W)


def _reference_upconv(x, weight, bias):
    # Pure-JAX reference of the same math (sanity check).
    y = jnp.einsum("ncdhw,coxyz->nodxhywz", x, weight)
    N, Co = x.shape[0], weight.shape[1]
    D, H, W = x.shape[2], x.shape[3], x.shape[4]
    y = y.reshape(N, Co, 2 * D, 2 * H, 2 * W)
    y = y + bias[None, :, None, None, None]
    return jnp.maximum(y, 0.0)


if __name__ == "__main__":
    key = jax.random.PRNGKey(0)
    k_x, k_w, k_b = jax.random.split(key, 3)

    # Small UNet-ish shapes: batch=2, in_channels=4, out_channels=2, spatial=8^3
    N, Cin, Cout, D, H, W = 2, 4, 2, 8, 8, 8
    x = jax.random.normal(k_x, (N, Cin, D, H, W), dtype=jnp.float32)

    # Deterministic parameter init (uniform, like PyTorch's default 1/sqrt(fan))
    fan = Cin * 2 * 2 * 2
    bound = 1.0 / (fan ** 0.5)
    weight = jax.random.uniform(k_w, (Cin, Cout, 2, 2, 2), jnp.float32,
                                minval=-bound, maxval=bound)
    bias = jax.random.uniform(k_b, (Cout,), jnp.float32,
                              minval=-bound, maxval=bound)

    out = jax.block_until_ready(upconv_forward(x, weight, bias))
    ref = _reference_upconv(x, weight, bias)

    assert out.shape == (N, Cout, 2 * D, 2 * H, 2 * W), out.shape
    # Tolerance accounts for the MXU's default (bf16-multiply) matmul precision
    # in both the kernel and the XLA reference; real layout/interleave bugs
    # would produce O(0.1-1) errors and still be caught.
    assert jnp.allclose(out, ref, atol=2e-2, rtol=2e-2), "mismatch vs reference"

    print("KERNEL_OK")
</pallas_src>

<mosaic_0001>
module attributes {stable_mosaic.version = 11 : i64} {
  func.func @_upconv_kernel(%arg0: i32, %arg1: i32, %arg2: memref<1x8x512xf32, #tpu.memory_space<vmem>>, %arg3: memref<16x8xf32, #tpu.memory_space<vmem>>, %arg4: memref<16x1xf32, #tpu.memory_space<vmem>>, %arg5: memref<1x16x512xf32, #tpu.memory_space<vmem>>) attributes {dimension_semantics = [#tpu.dimension_semantics<parallel>, #tpu.dimension_semantics<parallel>], iteration_bounds = array<i64: 2, 1>, scalar_prefetch = 0 : i64, scratch_operands = 0 : i64, tpu.core_type = #tpu.core_type<tc>, window_params = [{transform_indices = @transform_0, window_bounds = array<i64: 1, 8, 512>}, {pipeline_mode = #tpu.pipeline_mode<synchronous>, transform_indices = @transform_1, window_bounds = array<i64: 16, 8>}, {pipeline_mode = #tpu.pipeline_mode<synchronous>, transform_indices = @transform_2, window_bounds = array<i64: 16, 1>}, {transform_indices = @transform_3, window_bounds = array<i64: 1, 16, 512>}]} {
    %c0 = arith.constant 0 : index
    %c0_0 = arith.constant 0 : index
    %0 = vector.load %arg3[%c0, %c0_0] : memref<16x8xf32, #tpu.memory_space<vmem>>, vector<16x8xf32>
    %c0_1 = arith.constant 0 : index
    %c0_2 = arith.constant 0 : index
    %c0_3 = arith.constant 0 : index
    %1 = vector.load %arg2[%c0_1, %c0_2, %c0_3] : memref<1x8x512xf32, #tpu.memory_space<vmem>>, vector<1x8x512xf32>
    %2 = vector.shape_cast %1 : vector<1x8x512xf32> to vector<8x512xf32>
    %cst = arith.constant dense<0.000000e+00> : vector<16x512xf32>
    %3 = tpu.matmul %0, %2, %cst {dimension_numbers = #tpu.dot_dimension_numbers<[1], [0], [0], [1], [0, 0, 1, 1], [], []>} : vector<16x8xf32>, vector<8x512xf32>, vector<16x512xf32> -> vector<16x512xf32>
    %c0_4 = arith.constant 0 : index
    %c0_5 = arith.constant 0 : index
    %4 = vector.load %arg4[%c0_4, %c0_5] : memref<16x1xf32, #tpu.memory_space<vmem>>, vector<16x1xf32>
    %5 = vector.broadcast %4 : vector<16x1xf32> to vector<16x512xf32>
    %6 = arith.addf %3, %5 : vector<16x512xf32>
    %cst_6 = arith.constant 0.000000e+00 : f32
    %7 = vector.broadcast %cst_6 : f32 to vector<16x512xf32>
    %8 = arith.maximumf %6, %7 : vector<16x512xf32>
    %c0_7 = arith.constant 0 : index
    %c0_8 = arith.constant 0 : index
    %c0_9 = arith.constant 0 : index
    %9 = vector.load %arg5[%c0_7, %c0_8, %c0_9] : memref<1x16x512xf32, #tpu.memory_space<vmem>>, vector<1x16x512xf32>
    %10 = vector.shape_cast %9 : vector<1x16x512xf32> to vector<16x512xf32>
    %11 = vector.shape_cast %8 : vector<16x512xf32> to vector<1x16x512xf32>
    tpu.vector_store %arg5[%c0_7, %c0_8, %c0_9], %11 {strides = array<i32>} : memref<1x16x512xf32, #tpu.memory_space<vmem>>, vector<1x16x512xf32>,
    return
  }
  func.func @transform_0(%arg0: i32, %arg1: i32) -> (i32, i32, i32) {
    %c0_i32 = arith.constant 0 : i32
    %c0_i32_0 = arith.constant 0 : i32
    return %arg0, %c0_i32, %arg1 : i32, i32, i32
  }
  func.func @transform_1(%arg0: i32, %arg1: i32) -> (i32, i32) {
    %c0_i32 = arith.constant 0 : i32
    %c0_i32_0 = arith.constant 0 : i32
    %c0_i32_1 = arith.constant 0 : i32
    return %c0_i32, %c0_i32_0 : i32, i32
  }
  func.func @transform_2(%arg0: i32, %arg1: i32) -> (i32, i32) {
    %c0_i32 = arith.constant 0 : i32
    %c0_i32_0 = arith.constant 0 : i32
    %c0_i32_1 = arith.constant 0 : i32
    return %c0_i32, %c0_i32_0 : i32, i32
  }
  func.func @transform_3(%arg0: i32, %arg1: i32) -> (i32, i32, i32) {
    %c0_i32 = arith.constant 0 : i32
    %c0_i32_0 = arith.constant 0 : i32
    return %arg0, %c0_i32, %arg1 : i32, i32, i32
  }
}

</mosaic_0001>

<bundles_post_ra>
// kernel: upconv_forward.1
= control target key start
LH: loop header
LB: loop body
LE: loop exit
PB: predicated region body
PF: predicated region fallthrough
CT: control target
= control target key end

     0   :  { %s522_s12 = smov 0   ;;  %s524_s13 = smov 0   ;;  %s579_s0 = inlined_call_operand.vmem [shape: f32[2,8,512], index: 0, kind: input, shape index: {}]   ;;  %s580_s1 = inlined_call_operand.vmem [shape: f32[16,8], index: 1, kind: input, shape index: {}]   ;;  %s581_s2 = inlined_call_operand.vmem [shape: f32[16,1], index: 2, kind: input, shape index: {}]   ;;  %s582_s3 = inlined_call_operand.vmem [shape: f32[2,16,512], index: 3, kind: output, shape index: {}]  }
   0x1   :  { %s526_s14 = smov 0  }
   0x2 LB: > { %s25_s15 = sadd.s32 1, %s495_s13  ;;  %p434_p0 = scmp.ge.s32.totalorder %s499_s14, 1  ;;  %s499_s14 = sphi %s526_s14, %s13_s14   ;;  %s495_s13 = sphi %s524_s13, %s584_s13   ;;  %s491_s12 = sphi %s522_s12, %s583_s12  }
   0x3   : > { %p27_p1 = scmp.ge.s32.totalorder %s25_s15, 2  ;;  %p158_p2 = scmp.lt.s32.totalorder %s499_s14, 3 }
   0x5   : > { %s586_s15 = smov (%p27_p1, %s25_s15), 0  ;;  %p159_p3 = pnand %p434_p0, %p158_p2 }
   0x6   : > { %p191_p4 = scmp.lt.s32.totalorder (!%p159_p3), %s491_s12, 1 }
   0x7   : > { %162 = sbr.rel (%p159_p3) target bundleno = 165 (0xa5), region = 32 }
   0xc   : > { %v216_v0 = vld [vmem:[%s581_s2] sm:$0xff]  ;;  %v501_v1 = vmov 0   ;;  %s588_s12 = smov (!%p191_p4, %s491_s12), 1  ;;  %vm228_vm0 = vcmask 64512   ;;  %v217_v7 = vld [vmem:[%s581_s2 + $0x8] sm:$0xff] }
   0xd   : > { %476 = vset.pattern.permute.xlu0 %v501_v1  ;;  %s449_s18 = sshll.u32 %s588_s12, 5  ;;  %v210_v2 = vld [vmem:[%s580_s1] sm:$0xff]  ;;  %v211_v8 = vld [vmem:[%s580_s1 + $0x8] sm:$0xff]  ;;  %s450_s28 = sshll.u32 %s588_s12, 6 }
   0xe   : > { %220 = vperm.xlu0 %476, %v216_v0   ;;  %s198_s21 = scalar_lea.vmem %s579_s0, %s449_s18  ;;  %s208_s4 = scalar_lea.vmem %s582_s3, %s450_s28 }
   0xf   : > { %v212_v3 = vld [vmem:[%s198_s21] sm:$0xff]  ;;  %v213_v4 = vld [vmem:[%s198_s21 + $0x8] sm:$0xff]  ;;  %v214_v5 = vld [vmem:[%s198_s21 + $0x10] sm:$0xff] }
  0x10   : > { %250 = vmatpush.msra.mxu0 %v212_v3  ;;  %273 = vmatpush.msra.mxu1 %v213_v4  ;;  %v215_v6 = vld [vmem:[%s198_s21 + $0x18] sm:$0xff] }
  0x11   : > { %296 = vmatpush.msra.mxu2 %v214_v5  ;;  %319 = vmatpush.msra.mxu3 %v215_v6 }
  0x12   : > { %439 = vmatmul.msk.f32.vlgmr.msra.gmra.mxu0 %vm228_vm0, %v210_v2  ;;  %441 = vmatmul.msk.f32.vlgmr.msra.gmra.mxu1 %vm228_vm0, %v210_v2 }
  0x13   : > { %443 = vmatmul.msk.f32.vlgmr.msra.gmra.mxu2 %vm228_vm0, %v210_v2  ;;  %445 = vmatmul.msk.f32.vlgmr.msra.gmra.mxu3 %vm228_vm0, %v210_v2 }
  0x16   : > { %225 = vperm.xlu0 %476, %v217_v7  }
  0x1a   : > { %440 = vmatmul.msk.f32.gmra.mxu0 %vm228_vm0, %v211_v8  ;;  %442 = vmatmul.msk.f32.gmra.mxu1 %vm228_vm0, %v211_v8 }
  0x1b   : > { %444 = vmatmul.msk.f32.gmra.mxu2 %vm228_vm0, %v211_v8  ;;  %446 = vmatmul.msk.f32.gmra.mxu3 %vm228_vm0, %v211_v8 }
  0x80   : > { %v221_v9 = vpop.permute.xlu0 %220 }
  0x88   : > { %v226_v16 = vpop.permute.xlu0 %225 }
  0x8f   : > { %v252_v10 = vpop.f32.mrf.mxu0  ;;  %v275_v11 = vpop.f32.mrf.mxu1 }
  0x90   : > { %v253_v12 = vadd.f32 %v252_v10, %v221_v9  ;;  %v276_v13 = vadd.f32 %v275_v11, %v221_v9 }
  0x92   : > { %v327_v14 = vmax.f32 %v253_v12, 0.0  ;;  %v328_v15 = vmax.f32 %v276_v13, 0.0 }
  0x94   : > { %335 = vst [vmem:[%s208_s4] sm:$0xff] %v327_v14 }
  0x95   : > { %336 = vst [vmem:[%s208_s4 + $0x8] sm:$0xff] %v328_v15 }
  0x96   : > { %v298_v17 = vpop.f32.mrf.mxu2  ;;  %v321_v18 = vpop.f32.mrf.mxu3 }
  0x97   : > { %v299_v19 = vadd.f32 %v298_v17, %v221_v9  ;;  %v322_v20 = vadd.f32 %v321_v18, %v221_v9  ;;  %v255_v21 = vpop.f32.mrf.mxu0  ;;  %v278_v22 = vpop.f32.mrf.mxu1 }
  0x98   : > { %v256_v23 = vadd.f32 %v255_v21, %v226_v16  ;;  %v279_v24 = vadd.f32 %v278_v22, %v226_v16 }
  0x99   : > { %v329_v25 = vmax.f32 %v299_v19, 0.0  ;;  %v330_v26 = vmax.f32 %v322_v20, 0.0 }
  0x9a   : > { %v331_v27 = vmax.f32 %v256_v23, 0.0  ;;  %v332_v28 = vmax.f32 %v279_v24, 0.0 }
  0x9b   : > { %337 = vst [vmem:[%s208_s4 + $0x10] sm:$0xff] %v329_v25 }
  0x9c   : > { %338 = vst [vmem:[%s208_s4 + $0x18] sm:$0xff] %v330_v26 }
  0x9d   : > { %339 = vst [vmem:[%s208_s4 + $0x20] sm:$0xff] %v331_v27 }
  0x9e   : > { %340 = vst [vmem:[%s208_s4 + $0x28] sm:$0xff] %v332_v28  ;;  %v301_v29 = vpop.f32.mrf.mxu2  ;;  %v324_v30 = vpop.f32.mrf.mxu3 }
  0x9f   : > { %v302_v31 = vadd.f32 %v301_v29, %v226_v16  ;;  %v325_v32 = vadd.f32 %v324_v30, %v226_v16 }
  0xa1   : > { %v333_v33 = vmax.f32 %v302_v31, 0.0  ;;  %v334_v34 = vmax.f32 %v325_v32, 0.0 }
  0xa3   : > { %341 = vst [vmem:[%s208_s4 + $0x30] sm:$0xff] %v333_v33 }
  0xa4   : > { %342 = vst [vmem:[%s208_s4 + $0x38] sm:$0xff] %v334_v34 }
  0xa5 PF: > { %s13_s14 = sadd.s32 1, %s499_s14   ;;  %s583_s12 = smov %s495_s13 }
  0xa6   : > { %p10_p5 = scmp.ge.s32.totalorder %s13_s14, 4   ;;  %s584_s13 = smov %s586_s15 }
  0xa8   :  { %12 = sbr.rel (!%p10_p5) target bundleno = 2 (0x2), region = 62 }

</bundles_post_ra>
